<compile_context>
chip_gen: v5e
topology: v5e:2x2
jax: 0.10.0
libtpu: 0.0.40
codegen_flags: <defaults>
</compile_context>

<pallas_src>
import functools

import jax
import jax.numpy as jnp
from jax import lax
from jax.experimental import pallas as pl
from jax.experimental.pallas import tpu as pltpu

RHO = 1.0  # self.rho = 1 in the PyTorch module (no learned parameters)

# Lane slots used to pack the per-block partials into one (1, 1, 128) f32 tile
# (lane width 128 keeps the store layout-legal and unmasked).
_SUM_ABS, _SUM_WSQ, _MAX_T = 0, 1, 2


def _pack_partials(s_abs, s_wsq, t_max):
    lane = lax.broadcasted_iota(jnp.int32, (1, 128), 1)
    vec = jnp.where(lane == _SUM_ABS, s_abs,
          jnp.where(lane == _SUM_WSQ, s_wsq,
          jnp.where(lane == _MAX_T, t_max, jnp.float32(0.0))))
    return vec.reshape(1, 1, 128)


def _mlh_loss2_partials_kernel(out_ref, tgt_ref, part_ref, *,
                               rho, total_rows, block_rows, needs_mask):
    """Writes this block's partials: sum|o-t|, sum(w*(o-t)^2), max(t)."""
    i = pl.program_id(0)

    def compute(mask_rows):
        o = out_ref[...].astype(jnp.float32)          # (tb, C)
        t = tgt_ref[...].astype(jnp.float32)          # (tb, C)
        tb, c = o.shape
        diff = o - t
        absdiff = jnp.abs(diff)
        sq = diff * diff

        if mask_rows:
            # (tb, 1) row-validity mask; broadcasts over lanes in the selects.
            # Select-based masking is robust to NaN/Inf in the padded rows.
            row = lax.broadcasted_iota(jnp.int32, (tb, 1), 0) + i * block_rows
            valid = row < total_rows
            mask = lambda x, fill: jnp.where(valid, x, fill)
        else:
            mask = lambda x, fill: x

        if rho == 1.0:
            # Module default: weights are identically 1 -> skip all weight work.
            s_wsq = jnp.sum(mask(sq, 0.0))
        else:
            # General-rho path: c == T (full sequence per block).
            nd = c - 3
            tdiff = jnp.abs(t[:, 3:] - t[:, :-3])                     # (tb, T-3)
            avg = jnp.sum(tdiff, axis=1, keepdims=True) / nd          # (tb, 1)
            w_head = jnp.where(tdiff < avg, jnp.float32(rho), jnp.float32(1.0))
            row_wsq = (jnp.sum(sq[:, :nd] * w_head, axis=1, keepdims=True)
                       + jnp.sum(sq[:, nd:], axis=1, keepdims=True))  # (tb, 1)
            s_wsq = jnp.sum(mask(row_wsq, 0.0))

        s_abs = jnp.sum(mask(absdiff, 0.0))
        t_max = jnp.max(mask(t, -jnp.inf))
        part_ref[...] = _pack_partials(s_abs, s_wsq, t_max)

    if needs_mask:
        last = pl.num_programs(0) - 1

        @pl.when(i != last)
        def _steady():            # full blocks: no iota / selects in steady state
            compute(mask_rows=False)

        @pl.when(i == last)
        def _tail():              # only the partial tail block pays the mask
            compute(mask_rows=True)
    else:
        compute(mask_rows=False)


def _choose_lane_dim(n_elems):
    """Largest lane-dense width (multiple of 128) that evenly divides n_elems."""
    for c in (2048, 1024, 512, 256, 128):
        if n_elems % c == 0:
            return c
    return None


def _resolve_block_rows(n_rows, n_cols, in_itemsize, max_block_bytes_f32, block_rows):
    """Row tile: multiple of the sublane packing, sized by the f32 working set."""
    min_rows = 8 * max(1, 4 // in_itemsize)   # f32 -> 8 rows, bf16 -> 16
    if n_rows <= min_rows:
        return n_rows
    if block_rows is None:
        rows = max_block_bytes_f32 // (n_cols * 4)    # budget in f32 terms
    else:
        rows = min(int(block_rows), n_rows)
    rows = max((rows // min_rows) * min_rows, min_rows)
    return n_rows if rows >= n_rows else rows


def mlh_loss2(inputs, output, target, *, rho=RHO, block_rows=None,
              max_block_bytes_f32=2 * 1024 * 1024, vmem_limit_bytes=None):
    """Pallas implementation of MLHLoss2.forward(inputs, output, target)."""
    del inputs  # unused by the reference forward pass
    B, T = output.shape
    if T <= 3:
        raise ValueError("MLHLoss2 requires sequence length > 3")
    if output.shape != target.shape:
        raise ValueError("output / target shape mismatch")

    n_elems = B * T
    itemsize = jnp.dtype(output.dtype).itemsize

    # rho == 1: flatten to a lane-dense (rows, lanes) view whenever possible so
    # the sequence axis is effectively tiled too (long-T shapes still pipeline).
    lanes = _choose_lane_dim(n_elems) if rho == 1.0 else None
    if lanes is not None:
        R, C = n_elems // lanes, lanes
        out2d = output.reshape(R, C)
        tgt2d = target.reshape(R, C)
    else:
        R, C = B, T
        out2d, tgt2d = output, target
        # TODO(synk): if rho != 1 and T is extremely long, a single row block can
        # still exceed VMEM; tiling T for that path needs head-column masking.

    tb = _resolve_block_rows(R, C, itemsize, max_block_bytes_f32, block_rows)
    grid_b = pl.cdiv(R, tb)
    needs_mask = (R % tb) != 0

    # VMEM budget: 2 inputs x 2 pipeline buffers (native dtype) + f32 temporaries.
    vmem_est = 4 * tb * C * itemsize + 6 * tb * C * 4 + (1 << 20)
    if vmem_limit_bytes is None:
        vmem_limit_bytes = min(max(32 << 20, vmem_est), 64 << 20)

    kernel = functools.partial(
        _mlh_loss2_partials_kernel,
        rho=float(rho), total_rows=R, block_rows=tb, needs_mask=needs_mask)

    cost = pl.CostEstimate(
        flops=6 * n_elems,
        transcendentals=0,
        bytes_accessed=2 * n_elems * itemsize + grid_b * 128 * 4)

    partials = pl.pallas_call(
        kernel,
        out_shape=jax.ShapeDtypeStruct((grid_b, 1, 128), jnp.float32),
        grid=(grid_b,),
        in_specs=[
            pl.BlockSpec((tb, C), lambda i: (i, 0)),
            pl.BlockSpec((tb, C), lambda i: (i, 0)),
        ],
        out_specs=pl.BlockSpec((1, 1, 128), lambda i: (i, 0, 0)),
        compiler_params=pltpu.CompilerParams(
            dimension_semantics=("parallel",),
            vmem_limit_bytes=int(vmem_limit_bytes)),
        cost_estimate=cost,
    )(out2d, tgt2d)

    # Tiny final combine in the wrapper (keeps the grid axis "parallel").
    sum_abs = jnp.sum(partials[:, 0, _SUM_ABS])
    sum_wsq = jnp.sum(partials[:, 0, _SUM_WSQ])
    max_t = jnp.max(partials[:, 0, _MAX_T])

    mae = sum_abs / jnp.float32(n_elems)
    mse = sum_wsq                    # torch.mean(scalar) == scalar
    rmse = jnp.sqrt(mse)
    rrms = rmse / max_t
    return mae + mse + rmse + rrms


def mlh_loss2_ref(inputs, output, target, rho=RHO):
    """Pure-JAX reference mirroring the PyTorch forward exactly."""
    del inputs
    output = output.astype(jnp.float32)
    target = target.astype(jnp.float32)
    mae = jnp.mean(jnp.abs(output - target))
    losses = (output - target) ** 2
    td = jnp.abs(target[:, 3:] - target[:, :-3])
    avg = jnp.mean(td, axis=1, keepdims=True)
    w_head = jnp.where(td < avg, jnp.float32(rho), jnp.float32(1.0))
    w_tail = jnp.ones_like(target[:, -3:])
    weights = jnp.concatenate([w_head, w_tail], axis=1)
    mse = jnp.sum(losses * weights)          # mean of a scalar == scalar
    rmse = jnp.sqrt(mse)
    rrms = rmse / jnp.max(target)
    return mae + mse + rmse + rrms


if __name__ == "__main__":
    key = jax.random.PRNGKey(0)
    ks = jax.random.split(key, 12)

    # Case 1: module-default config (rho=1), f32, small shape, single block.
    B, T = 4, 128
    inputs = jax.random.normal(ks[0], (B, T), dtype=jnp.float32)
    output = jax.random.normal(ks[1], (B, T), dtype=jnp.float32)
    target = jax.random.normal(ks[2], (B, T), dtype=jnp.float32)
    got = jax.block_until_ready(mlh_loss2(inputs, output, target))
    ref = mlh_loss2_ref(inputs, output, target)
    assert jnp.allclose(got, ref, rtol=1e-4, atol=1e-4), (got, ref)

    # Case 2: flattened lane-dense layout, multi-step "parallel" grid with a
    # masked partial last block (48*1024 -> (24, 2048), tb=16 -> blocks 16+8).
    B2, T2 = 48, 1024
    out2 = jax.random.normal(ks[3], (B2, T2), dtype=jnp.float32)
    tgt2 = jax.random.normal(ks[4], (B2, T2), dtype=jnp.float32)
    got2 = jax.block_until_ready(mlh_loss2(None, out2, tgt2, block_rows=16))
    ref2 = mlh_loss2_ref(None, out2, tgt2)
    assert jnp.allclose(got2, ref2, rtol=1e-4, atol=1e-4), (got2, ref2)

    # Case 3: native bf16 inputs go straight into the kernel (no wrapper up-cast).
    out3 = jax.random.normal(ks[5], (20, 128), dtype=jnp.float32).astype(jnp.bfloat16)
    tgt3 = jax.random.normal(ks[6], (20, 128), dtype=jnp.float32).astype(jnp.bfloat16)
    got3 = jax.block_until_ready(mlh_loss2(None, out3, tgt3))
    ref3 = mlh_loss2_ref(None, out3, tgt3)
    assert jnp.allclose(got3, ref3, rtol=1e-3, atol=1e-3), (got3, ref3)

    # Case 4: T not a multiple of 128 and not flattenable -> (B, T) fallback
    # layout with a masked partial last row block.
    out4 = jax.random.normal(ks[7], (20, 100), dtype=jnp.float32)
    tgt4 = jax.random.normal(ks[8], (20, 100), dtype=jnp.float32)
    got4 = jax.block_until_ready(mlh_loss2(None, out4, tgt4, block_rows=8))
    ref4 = mlh_loss2_ref(None, out4, tgt4)
    assert jnp.allclose(got4, ref4, rtol=1e-4, atol=1e-4), (got4, ref4)

    # Case 5: general rho != 1 path (full-T blocks, slice-based weights).
    out5 = jax.random.normal(ks[9], (8, 64), dtype=jnp.float32)
    tgt5 = jax.random.normal(ks[10], (8, 64), dtype=jnp.float32)
    got5 = jax.block_until_ready(mlh_loss2(None, out5, tgt5, rho=0.5))
    ref5 = mlh_loss2_ref(None, out5, tgt5, rho=0.5)
    assert jnp.allclose(got5, ref5, rtol=1e-4, atol=1e-4), (got5, ref5)

    print("KERNEL_OK")
</pallas_src>

<mosaic_0001>
module attributes {stable_mosaic.version = 11 : i64} {
  func.func @_mlh_loss2_partials_kernel(%arg0: i32, %arg1: memref<1x512xf32, #tpu.memory_space<vmem>>, %arg2: memref<1x512xf32, #tpu.memory_space<vmem>>, %arg3: memref<1x1x128xf32, #tpu.memory_space<vmem>>) attributes {dimension_semantics = [#tpu.dimension_semantics<parallel>], iteration_bounds = array<i64: 1>, scalar_prefetch = 0 : i64, scratch_operands = 0 : i64, tpu.core_type = #tpu.core_type<tc>, window_params = [{transform_indices = @transform_0, window_bounds = array<i64: 1, 512>}, {transform_indices = @transform_1, window_bounds = array<i64: 1, 512>}, {transform_indices = @transform_2, window_bounds = array<i64: 1, 1, 128>}]} {
    %c0 = arith.constant 0 : index
    %c0_0 = arith.constant 0 : index
    %0 = vector.load %arg1[%c0, %c0_0] : memref<1x512xf32, #tpu.memory_space<vmem>>, vector<1x512xf32>
    %c0_1 = arith.constant 0 : index
    %c0_2 = arith.constant 0 : index
    %1 = vector.load %arg2[%c0_1, %c0_2] : memref<1x512xf32, #tpu.memory_space<vmem>>, vector<1x512xf32>
    %2 = arith.subf %0, %1 : vector<1x512xf32>
    %3 = math.absf %2 : vector<1x512xf32>
    %4 = arith.mulf %2, %2 : vector<1x512xf32>
    %5 = vector.shape_cast %4 : vector<1x512xf32> to vector<1x1x512xf32>
    %cst = arith.constant dense<0.000000e+00> : vector<1xf32>
    %6 = vector.multi_reduction <add>, %5, %cst [1, 2] : vector<1x1x512xf32> to vector<1xf32>
    %7 = vector.shape_cast %6 : vector<1xf32> to vector<1x1x1xf32>
    %8 = vector.extract %7[0, 0, 0] : f32 from vector<1x1x1xf32>
    %9 = vector.shape_cast %3 : vector<1x512xf32> to vector<1x1x512xf32>
    %cst_3 = arith.constant dense<0.000000e+00> : vector<1xf32>
    %10 = vector.multi_reduction <add>, %9, %cst_3 [1, 2] : vector<1x1x512xf32> to vector<1xf32>
    %11 = vector.shape_cast %10 : vector<1xf32> to vector<1x1x1xf32>
    %12 = vector.extract %11[0, 0, 0] : f32 from vector<1x1x1xf32>
    %13 = vector.shape_cast %1 : vector<1x512xf32> to vector<1x1x512xf32>
    %cst_4 = arith.constant dense<0xFF800000> : vector<1xf32>
    %14 = vector.multi_reduction <maximumf>, %13, %cst_4 [1, 2] : vector<1x1x512xf32> to vector<1xf32>
    %15 = vector.shape_cast %14 : vector<1xf32> to vector<1x1x1xf32>
    %16 = vector.extract %15[0, 0, 0] : f32 from vector<1x1x1xf32>
    %17 = tpu.iota {dimensions = array<i32: 1>} : vector<1x128xi32>
    %c0_i32 = arith.constant 0 : i32
    %18 = vector.broadcast %c0_i32 : i32 to vector<1x128xi32>
    %19 = arith.cmpi eq, %17, %18 : vector<1x128xi32>
    %c1_i32 = arith.constant 1 : i32
    %20 = vector.broadcast %c1_i32 : i32 to vector<1x128xi32>
    %21 = arith.cmpi eq, %17, %20 : vector<1x128xi32>
    %c2_i32 = arith.constant 2 : i32
    %22 = vector.broadcast %c2_i32 : i32 to vector<1x128xi32>
    %23 = arith.cmpi eq, %17, %22 : vector<1x128xi32>
    %cst_5 = arith.constant 0.000000e+00 : f32
    %24 = vector.broadcast %16 : f32 to vector<1x128xf32>
    %25 = vector.broadcast %cst_5 : f32 to vector<1x128xf32>
    %26 = arith.select %23, %24, %25 : vector<1x128xi1>, vector<1x128xf32>
    %27 = vector.broadcast %8 : f32 to vector<1x128xf32>
    %28 = arith.select %21, %27, %26 : vector<1x128xi1>, vector<1x128xf32>
    %29 = vector.broadcast %12 : f32 to vector<1x128xf32>
    %30 = arith.select %19, %29, %28 : vector<1x128xi1>, vector<1x128xf32>
    %31 = vector.shape_cast %30 : vector<1x128xf32> to vector<1x1x128xf32>
    %c0_6 = arith.constant 0 : index
    %c0_7 = arith.constant 0 : index
    %c0_8 = arith.constant 0 : index
    %32 = vector.load %arg3[%c0_6, %c0_7, %c0_8] : memref<1x1x128xf32, #tpu.memory_space<vmem>>, vector<1x1x128xf32>
    tpu.vector_store %arg3[%c0_6, %c0_7, %c0_8], %31 {strides = array<i32>} : memref<1x1x128xf32, #tpu.memory_space<vmem>>, vector<1x1x128xf32>,
    return
  }
  func.func @transform_0(%arg0: i32) -> (i32, i32) {
    %c0_i32 = arith.constant 0 : i32
    %c0_i32_0 = arith.constant 0 : i32
    return %arg0, %c0_i32 : i32, i32
  }
  func.func @transform_1(%arg0: i32) -> (i32, i32) {
    %c0_i32 = arith.constant 0 : i32
    %c0_i32_0 = arith.constant 0 : i32
    return %arg0, %c0_i32 : i32, i32
  }
  func.func @transform_2(%arg0: i32) -> (i32, i32, i32) {
    %c0_i32 = arith.constant 0 : i32
    %c0_i32_0 = arith.constant 0 : i32
    %c0_i32_1 = arith.constant 0 : i32
    return %arg0, %c0_i32, %c0_i32_0 : i32, i32, i32
  }
}

</mosaic_0001>

<bundles_post_ra>
// kernel: tpu_custom_call.1
= control target key start
LH: loop header
LB: loop body
LE: loop exit
PB: predicated region body
PF: predicated region fallthrough
CT: control target
= control target key end

     0   :  { %7 = vsyncpa [#allocation3], 0  ;;  %s277_s0 = inlined_call_operand.hbm [shape: f32[1,512], index: 0, kind: input, shape index: {}]   ;;  %s278_s1 = inlined_call_operand.hbm [shape: f32[1,512], index: 1, kind: input, shape index: {}]   ;;  %s279_s2 = inlined_call_operand.hbm [shape: f32[1,1,128], index: 2, kind: output, shape index: {}]  }
   0x1   :  { %8 = vsyncpa [#allocation6], 0 }
   0x2   :  { %9 = vsyncpa [#allocation4], 0  ;;  %s15_s11 = sshll.u32 %s277_s0, 4  ;;  %s238_s12 = smov [#allocation2]   ;;  %s16_s11 = int_to_ptr.hbm [resolvable:$true] %s15_s11 }
   0x3   :  { %s17_s13 = sshll.u32 %s238_s12, 4  ;;  %s26_s16 = sshll.u32 %s278_s1, 4  ;;  %s18_s13 = int_to_ptr.vmem [resolvable:$true] %s17_s13  ;;  %s27_s16 = int_to_ptr.hbm [resolvable:$true] %s26_s16 }
   0x4   :  { %20 = dma.hbm_to_vmem [thread:$0]  %s16_s11, 64, %s18_s13, [#allocation3]  }
   0x5   :  { %s239_s17 = smov [#allocation5]  }
   0x6   :  { %s28_s18 = sshll.u32 %s239_s17, 4  ;;  %s29_s18 = int_to_ptr.vmem [resolvable:$true] %s28_s18 }
   0x7   :  { %31 = dma.hbm_to_vmem [thread:$0]  %s27_s16, 64, %s29_s18, [#allocation6]  }
   0x8   :  { %232 = dma.done.wait [#allocation3], 64  }
   0x9   :  { %233 = vsyncadd [#allocation3], 4294967232 }
   0xa   :  { %234 = dma.done.wait [#allocation6], 64  }
   0xb   :  { %235 = vsyncadd [#allocation6], 4294967232  ;;  %v40_v0 = vld [vmem:[#allocation2] sm:$0xf]  ;;  %v41_v1 = vld [vmem:[#allocation5] sm:$0xf]  ;;  %v121_v59 = vlaneseq }
   0xc   :  { %v42_v2 = vsub.f32 %v40_v0, %v41_v1  ;;  %v97_v3 = vperm.slane %v41_v1, 0  ;;  %v98_v4 = vperm.slane %v41_v1, 1  ;;  %v99_v5 = vperm.slane %v41_v1, 2  ;;  %s240_s19 = smov [#allocation7]   ;;  %s140_s24 = sshll.u32 %s279_s2, 4  ;;  %s141_s24 = int_to_ptr.hbm [resolvable:$true] %s140_s24 }
   0xd   :  { %vm54_vm0 = vcmask 1040384   ;;  %v100_v6 = vperm.slane %v41_v1, 3  ;;  %v122_v60 = vand.u32 127, %v121_v59  ;;  %s138_s20 = sshll.u32 %s240_s19, 4  ;;  %s139_s20 = int_to_ptr.vmem [resolvable:$true] %s138_s20 }
   0xe   :  { %v44_v7 = vmul.f32 %v42_v2, %v42_v2  ;;  %v105_v8 = vsel %vm54_vm0, %v97_v3, -inf  ;;  %v106_v9 = vsel %vm54_vm0, %v98_v4, -inf  ;;  %v107_v10 = vsel %vm54_vm0, %v99_v5, -inf }
   0xf   :  { %v108_v11 = vsel %vm54_vm0, %v100_v6, -inf  ;;  %v109_v12 = vmax.f32 %v105_v8, %v106_v9  ;;  %v43_v13 = vand.u32 2147483647, %v42_v2  ;;  %vm125_vm1 = vcmp.eq.s32.totalorder %v122_v60, 2 }
  0x10   :  { %v46_v14 = vperm.slane %v44_v7, 0  ;;  %v47_v15 = vperm.slane %v44_v7, 1  ;;  %v48_v16 = vperm.slane %v44_v7, 2  ;;  %v49_v17 = vperm.slane %v44_v7, 3 }
  0x11   :  { %v110_v18 = vmax.f32 %v107_v10, %v108_v11  ;;  %v72_v19 = vperm.slane %v43_v13, 0  ;;  %v73_v20 = vperm.slane %v43_v13, 1  ;;  %v74_v24 = vperm.slane %v43_v13, 2 }
  0x12   :  { %v55_v21 = vsel %vm54_vm0, %v46_v14, 0.0  ;;  %v56_v22 = vsel %vm54_vm0, %v47_v15, 0.0  ;;  %v58_v23 = vsel %vm54_vm0, %v48_v16, 0.0  ;;  %v60_v28 = vsel %vm54_vm0, %v49_v17, 0.0 }
  0x13   :  { %v57_v25 = vadd.f32 %v56_v22, %v55_v21  ;;  %v111_v26 = vmax.f32 %v109_v12, %v110_v18  ;;  %v80_v27 = vsel %vm54_vm0, %v72_v19, 0.0  ;;  %v81_v29 = vsel %vm54_vm0, %v73_v20, 0.0 }
  0x14   :  { %v82_v31 = vadd.f32 %v81_v29, %v80_v27  ;;  %v75_v32 = vperm.slane %v43_v13, 3  ;;  %v83_v33 = vsel %vm54_vm0, %v74_v24, 0.0  ;;  %vm124_vm2 = vcmp.eq.s32.totalorder %v122_v60, 1 }
  0x15   :  { %v59_v30 = vadd.f32 %v58_v23, %v57_v25  ;;  %112 = vmax.xlane.f32.xlu1 %v111_v26  ;;  %vm123_vm3 = vcmp.eq.s32.totalorder %v122_v60, 0 }
  0x16   :  { %v84_v35 = vadd.f32 %v83_v33, %v82_v31  ;;  %v85_v36 = vsel %vm54_vm0, %v75_v32, 0.0 }
  0x17   :  { %v61_v34 = vadd.f32 %v60_v28, %v59_v30 }
  0x18   :  { %v86_v37 = vadd.f32 %v85_v36, %v84_v35 }
  0x19   :  { %62 = vadd.xlane.f32.xlu0 %v61_v34 }
  0x21   :  { %87 = vadd.xlane.f32.xlu0 %v86_v37 }
  0x88   :  { %v113_v38 = vpop.xlane.xlu1 %112 }
  0x89   :  { %v114_v40 = vrot.slane %v113_v38, 4 }
  0x8b   :  { %v115_v43 = vmax.f32 %v113_v38, %v114_v40 }
  0x8c   :  { %v63_v39 = vpop.xlane.xlu0 %62 }
  0x8d   :  { %v64_v41 = vrot.slane %v63_v39, 4  ;;  %v116_v46 = vrot.slane %v115_v43, 2 }
  0x8f   :  { %v65_v42 = vadd.f32 %v64_v41, %v63_v39  ;;  %v117_v52 = vmax.f32 %v115_v43, %v116_v46 }
  0x91   :  { %v66_v44 = vrot.slane %v65_v42, 2  ;;  %v118_v55 = vrot.slane %v117_v52, 1 }
  0x93   :  { %v67_v45 = vadd.f32 %v66_v44, %v65_v42  ;;  %v119_v58 = vmax.f32 %v117_v52, %v118_v55 }
  0x94   :  { %v88_v47 = vpop.xlane.xlu0 %87 }
  0x95   :  { %v89_v48 = vrot.slane %v88_v47, 4  ;;  %v68_v49 = vrot.slane %v67_v45, 1 }
  0x97   :  { %v90_v50 = vadd.f32 %v89_v48, %v88_v47  ;;  %v69_v51 = vadd.f32 %v68_v49, %v67_v45 }
  0x99   :  { %v91_v53 = vrot.slane %v90_v50, 2  ;;  %151 = vpush %v69_v51 }
  0x9b   :  { %v92_v54 = vadd.f32 %v91_v53, %v90_v50 }
  0x9d   :  { %v93_v56 = vrot.slane %v92_v54, 1 }
  0x9f   :  { %v94_v57 = vadd.f32 %v93_v56, %v92_v54 }
  0xa1   :  { %153 = vpush %v94_v57 }
  0xa2   :  { %155 = vpush %v119_v58 }
  0xca   :  { %s152_s0 = spop %151 }
  0xcb   :  { %v128_v62 = vstv %s152_s0 }
  0xd2   :  { %s154_s1 = spop %153 }
  0xd3   :  { %s156_s21 = spop %155  ;;  %v130_v0 = vstv %s154_s1 }
  0xd4   :  { %v126_v61 = vstv %s156_s21 }
  0xd5   :  { %v127_v63 = vsel %vm125_vm1, %v126_v61, 0.0 }
  0xd6   :  { %v129_v1 = vsel %vm124_vm2, %v128_v62, %v127_v63 }
  0xd7   :  { %v131_v2 = vsel %vm123_vm3, %v130_v0, %v129_v1 }
  0xd8   :  { %132 = vst [vmem:[#allocation7] sm:$0x1] %v131_v2 }
  0xd9   :  { %143 = dma.vmem_to_hbm [thread:$0]  %s139_s20, 16, %s141_s24, [#allocation4]  }
  0xda   :  { %236 = dma.done.wait [#allocation4], 16  }
  0xdb   :  { %237 = vsyncadd [#allocation4], 4294967280 }
  0xdc   :  { %148 = vsyncpa [#allocation3], 1 }
  0xdd   :  { %149 = vsyncpa [#allocation6], 1 }
  0xde   :  { %150 = vsyncpa [#allocation4], 1 }

</bundles_post_ra>
